<compile_context>
chip_gen: v7x
topology: tpu7x:2x2x1
jax: 0.10.0
libtpu: 0.0.40
codegen_flags: <defaults>
</compile_context>

<pallas_src>
import functools

import jax
import jax.numpy as jnp
from jax.experimental import pallas as pl
from jax.experimental.pallas import tpu as pltpu

IN_DIM = 93
DIMS = [(93, 64), (64, 32), (32, 16), (16, 9)]
OUT_DIM = 9


def otto_kernel(x_ref,
                w1_ref, b1_ref,
                w2_ref, b2_ref,
                w3_ref, b3_ref,
                w4_ref, b4_ref,
                o_ref):
    x = x_ref[...]  # (TB, 93) bf16

    # linear1 + ReLU  (bf16 inputs, f32 accumulation)
    h1 = jnp.dot(x, w1_ref[...], preferred_element_type=jnp.float32) + b1_ref[...]
    h1 = jnp.maximum(h1, 0.0)

    # linear2 + ReLU
    h2 = jnp.dot(h1.astype(jnp.bfloat16), w2_ref[...],
                 preferred_element_type=jnp.float32) + b2_ref[...]
    h2 = jnp.maximum(h2, 0.0)

    # TODO(synk): torch.nn.Dropout(p=0.1) is identity in eval mode; training-mode
    # stochastic masking (pltpu.prng_random_bits) is intentionally not applied.

    # linear3 + ReLU
    h3 = jnp.dot(h2.astype(jnp.bfloat16), w3_ref[...],
                 preferred_element_type=jnp.float32) + b3_ref[...]
    h3 = jnp.maximum(h3, 0.0)

    # linear4 (logits)
    logits = jnp.dot(h3.astype(jnp.bfloat16), w4_ref[...],
                     preferred_element_type=jnp.float32) + b4_ref[...]

    # softmax over dim=1 (class axis), max-stabilized, f32; divide -> EUP approx rcp
    m = jnp.max(logits, axis=1, keepdims=True)
    e = jnp.exp(logits - m)
    denom = jnp.sum(e, axis=1, keepdims=True)
    o_ref[...] = e * pl.reciprocal(denom, approx=True)


def _round_up(n, m):
    return ((n + m - 1) // m) * m


def otto_net(x, params, *, block_rows=2048):
    """x: (..., 93) float-ish; flattened like x.view(-1, 93). Returns (N, 9) f32."""
    x = x.reshape(-1, IN_DIM)
    b = x.shape[0]

    # bf16 for the dominant streamed operand; pick a batch tile (multiple of 16 for
    # bf16 sublane packing) and pad the batch up to a multiple of it.
    xb = x.astype(jnp.bfloat16)
    tb = min(block_rows, _round_up(b, 16))
    b_pad = _round_up(b, tb)
    if b_pad != b:
        xb = jnp.pad(xb, ((0, b_pad - b), (0, 0)))

    (w1, b1), (w2, b2), (w3, b3), (w4, b4) = params
    w1, w2, w3, w4 = (w.astype(jnp.bfloat16) for w in (w1, w2, w3, w4))
    b1, b2, b3, b4 = (bb.astype(jnp.float32) for bb in (b1, b2, b3, b4))

    grid = (b_pad // tb,)

    def const_spec(arr):
        # Full-array block, constant index_map -> stays VMEM-resident across steps.
        return pl.BlockSpec(arr.shape, lambda i: (0, 0))

    flops_per_row = 2 * sum(fi * fo for fi, fo in DIMS)            # = 17312
    param_bytes = sum(fi * fo * 2 + fo * 4 for fi, fo in DIMS)
    cost = pl.CostEstimate(
        flops=b_pad * flops_per_row,
        transcendentals=b_pad * (OUT_DIM + 1),                     # exp + rcp
        bytes_accessed=b_pad * (IN_DIM * 2 + OUT_DIM * 4) + param_bytes,
    )

    out = pl.pallas_call(
        otto_kernel,
        out_shape=jax.ShapeDtypeStruct((b_pad, OUT_DIM), jnp.float32),
        grid=grid,
        in_specs=[
            pl.BlockSpec((tb, IN_DIM), lambda i: (i, 0)),          # x: batch-tiled
            const_spec(w1), const_spec(b1),
            const_spec(w2), const_spec(b2),
            const_spec(w3), const_spec(b3),
            const_spec(w4), const_spec(b4),
        ],
        out_specs=pl.BlockSpec((tb, OUT_DIM), lambda i: (i, 0)),
        compiler_params=pltpu.CompilerParams(
            dimension_semantics=("parallel",)),
        cost_estimate=cost,
    )(xb, w1, b1, w2, b2, w3, b3, w4, b4)

    return out[:b]


def otto_ref(x, params):
    """Pure-JAX f32 reference (eval mode: dropout is identity)."""
    x = x.reshape(-1, IN_DIM).astype(jnp.float32)
    (w1, b1), (w2, b2), (w3, b3), (w4, b4) = params
    h = jax.nn.relu(x @ w1 + b1)
    h = jax.nn.relu(h @ w2 + b2)
    h = jax.nn.relu(h @ w3 + b3)
    logits = h @ w4 + b4
    return jax.nn.softmax(logits, axis=1)


def init_params(key):
    """Mimics torch.nn.Linear default init: U(-1/sqrt(fan_in), 1/sqrt(fan_in)).
    Weights stored as (in, out) so the kernel computes x @ W + b (== x @ W_t.T)."""
    params = []
    for fan_in, fan_out in DIMS:
        key, kw, kb = jax.random.split(key, 3)
        bound = 1.0 / jnp.sqrt(jnp.float32(fan_in))
        w = jax.random.uniform(kw, (fan_in, fan_out), jnp.float32, -bound, bound)
        bias = jax.random.uniform(kb, (1, fan_out), jnp.float32, -bound, bound)
        params.append((w, bias))
    return params


if __name__ == "__main__":
    key = jax.random.PRNGKey(0)
    kx, kp = jax.random.split(key)
    params = init_params(kp)

    # Small test 1: batch=8 (padded to one 16-row tile).
    batch = 8
    x = jax.random.normal(kx, (batch, IN_DIM), dtype=jnp.float32)
    out = jax.block_until_ready(otto_net(x, params))
    ref = otto_ref(x, params)

    assert out.shape == (batch, OUT_DIM), out.shape
    # bf16 inputs + approx reciprocal => allow ~1e-2 level deviation from f32 ref.
    assert jnp.allclose(jnp.sum(out, axis=1), 1.0, atol=5e-3)
    assert jnp.allclose(out, ref, atol=2e-2), float(jnp.max(jnp.abs(out - ref)))

    # Small test 2: exercise multiple grid steps + ragged-batch padding.
    batch2 = 40
    x2 = jax.random.normal(jax.random.PRNGKey(1), (batch2, IN_DIM), dtype=jnp.float32)
    out2 = jax.block_until_ready(otto_net(x2, params, block_rows=16))
    ref2 = otto_ref(x2, params)
    assert out2.shape == (batch2, OUT_DIM), out2.shape
    assert jnp.allclose(out2, ref2, atol=2e-2), float(jnp.max(jnp.abs(out2 - ref2)))

    print("KERNEL_OK")
</pallas_src>

<mosaic_0001>
module attributes {stable_mosaic.version = 11 : i64} {
  func.func @otto_kernel(%arg0: i32, %arg1: memref<16x93xbf16, #tpu.memory_space<vmem>>, %arg2: memref<93x64xbf16, #tpu.memory_space<vmem>>, %arg3: memref<1x64xf32, #tpu.memory_space<vmem>>, %arg4: memref<64x32xbf16, #tpu.memory_space<vmem>>, %arg5: memref<1x32xf32, #tpu.memory_space<vmem>>, %arg6: memref<32x16xbf16, #tpu.memory_space<vmem>>, %arg7: memref<1x16xf32, #tpu.memory_space<vmem>>, %arg8: memref<16x9xbf16, #tpu.memory_space<vmem>>, %arg9: memref<1x9xf32, #tpu.memory_space<vmem>>, %arg10: memref<16x9xf32, #tpu.memory_space<vmem>>) attributes {dimension_semantics = [#tpu.dimension_semantics<parallel>], iteration_bounds = array<i64: 1>, scalar_prefetch = 0 : i64, scratch_operands = 0 : i64, tpu.core_type = #tpu.core_type<tc>, window_params = [{transform_indices = @transform_0, window_bounds = array<i64: 16, 93>}, {pipeline_mode = #tpu.pipeline_mode<synchronous>, transform_indices = @transform_1, window_bounds = array<i64: 93, 64>}, {pipeline_mode = #tpu.pipeline_mode<synchronous>, transform_indices = @transform_2, window_bounds = array<i64: 1, 64>}, {pipeline_mode = #tpu.pipeline_mode<synchronous>, transform_indices = @transform_3, window_bounds = array<i64: 64, 32>}, {pipeline_mode = #tpu.pipeline_mode<synchronous>, transform_indices = @transform_4, window_bounds = array<i64: 1, 32>}, {pipeline_mode = #tpu.pipeline_mode<synchronous>, transform_indices = @transform_5, window_bounds = array<i64: 32, 16>}, {pipeline_mode = #tpu.pipeline_mode<synchronous>, transform_indices = @transform_6, window_bounds = array<i64: 1, 16>}, {pipeline_mode = #tpu.pipeline_mode<synchronous>, transform_indices = @transform_7, window_bounds = array<i64: 16, 9>}, {pipeline_mode = #tpu.pipeline_mode<synchronous>, transform_indices = @transform_8, window_bounds = array<i64: 1, 9>}, {transform_indices = @transform_9, window_bounds = array<i64: 16, 9>}]} {
    %c0 = arith.constant 0 : index
    %c0_0 = arith.constant 0 : index
    %0 = vector.load %arg1[%c0, %c0_0] : memref<16x93xbf16, #tpu.memory_space<vmem>>, vector<16x93xbf16>
    %c0_1 = arith.constant 0 : index
    %c0_2 = arith.constant 0 : index
    %1 = vector.load %arg2[%c0_1, %c0_2] : memref<93x64xbf16, #tpu.memory_space<vmem>>, vector<93x64xbf16>
    %cst = arith.constant dense<0.000000e+00> : vector<16x64xf32>
    %2 = tpu.matmul %0, %1, %cst {dimension_numbers = #tpu.dot_dimension_numbers<[1], [0], [0], [1], [0, 0, 1, 1], [], []>} : vector<16x93xbf16>, vector<93x64xbf16>, vector<16x64xf32> -> vector<16x64xf32>
    %c0_3 = arith.constant 0 : index
    %c0_4 = arith.constant 0 : index
    %3 = vector.load %arg3[%c0_3, %c0_4] : memref<1x64xf32, #tpu.memory_space<vmem>>, vector<1x64xf32>
    %4 = vector.broadcast %3 : vector<1x64xf32> to vector<16x64xf32>
    %5 = arith.addf %2, %4 : vector<16x64xf32>
    %cst_5 = arith.constant 0.000000e+00 : f32
    %6 = vector.broadcast %cst_5 : f32 to vector<16x64xf32>
    %7 = arith.maximumf %5, %6 : vector<16x64xf32>
    %8 = arith.truncf %7 : vector<16x64xf32> to vector<16x64xbf16>
    %c0_6 = arith.constant 0 : index
    %c0_7 = arith.constant 0 : index
    %9 = vector.load %arg4[%c0_6, %c0_7] : memref<64x32xbf16, #tpu.memory_space<vmem>>, vector<64x32xbf16>
    %cst_8 = arith.constant dense<0.000000e+00> : vector<16x32xf32>
    %10 = tpu.matmul %8, %9, %cst_8 {dimension_numbers = #tpu.dot_dimension_numbers<[1], [0], [0], [1], [0, 0, 1, 1], [], []>} : vector<16x64xbf16>, vector<64x32xbf16>, vector<16x32xf32> -> vector<16x32xf32>
    %c0_9 = arith.constant 0 : index
    %c0_10 = arith.constant 0 : index
    %11 = vector.load %arg5[%c0_9, %c0_10] : memref<1x32xf32, #tpu.memory_space<vmem>>, vector<1x32xf32>
    %12 = vector.broadcast %11 : vector<1x32xf32> to vector<16x32xf32>
    %13 = arith.addf %10, %12 : vector<16x32xf32>
    %cst_11 = arith.constant 0.000000e+00 : f32
    %14 = vector.broadcast %cst_11 : f32 to vector<16x32xf32>
    %15 = arith.maximumf %13, %14 : vector<16x32xf32>
    %16 = arith.truncf %15 : vector<16x32xf32> to vector<16x32xbf16>
    %c0_12 = arith.constant 0 : index
    %c0_13 = arith.constant 0 : index
    %17 = vector.load %arg6[%c0_12, %c0_13] : memref<32x16xbf16, #tpu.memory_space<vmem>>, vector<32x16xbf16>
    %cst_14 = arith.constant dense<0.000000e+00> : vector<16x16xf32>
    %18 = tpu.matmul %16, %17, %cst_14 {dimension_numbers = #tpu.dot_dimension_numbers<[1], [0], [0], [1], [0, 0, 1, 1], [], []>} : vector<16x32xbf16>, vector<32x16xbf16>, vector<16x16xf32> -> vector<16x16xf32>
    %c0_15 = arith.constant 0 : index
    %c0_16 = arith.constant 0 : index
    %19 = vector.load %arg7[%c0_15, %c0_16] : memref<1x16xf32, #tpu.memory_space<vmem>>, vector<1x16xf32>
    %20 = vector.broadcast %19 : vector<1x16xf32> to vector<16x16xf32>
    %21 = arith.addf %18, %20 : vector<16x16xf32>
    %cst_17 = arith.constant 0.000000e+00 : f32
    %22 = vector.broadcast %cst_17 : f32 to vector<16x16xf32>
    %23 = arith.maximumf %21, %22 : vector<16x16xf32>
    %24 = arith.truncf %23 : vector<16x16xf32> to vector<16x16xbf16>
    %c0_18 = arith.constant 0 : index
    %c0_19 = arith.constant 0 : index
    %25 = vector.load %arg8[%c0_18, %c0_19] : memref<16x9xbf16, #tpu.memory_space<vmem>>, vector<16x9xbf16>
    %cst_20 = arith.constant dense<0.000000e+00> : vector<16x9xf32>
    %26 = tpu.matmul %24, %25, %cst_20 {dimension_numbers = #tpu.dot_dimension_numbers<[1], [0], [0], [1], [0, 0, 1, 1], [], []>} : vector<16x16xbf16>, vector<16x9xbf16>, vector<16x9xf32> -> vector<16x9xf32>
    %c0_21 = arith.constant 0 : index
    %c0_22 = arith.constant 0 : index
    %27 = vector.load %arg9[%c0_21, %c0_22] : memref<1x9xf32, #tpu.memory_space<vmem>>, vector<1x9xf32>
    %28 = vector.broadcast %27 : vector<1x9xf32> to vector<16x9xf32>
    %29 = arith.addf %26, %28 : vector<16x9xf32>
    %cst_23 = arith.constant dense<0xFF800000> : vector<16xf32>
    %30 = vector.multi_reduction <maximumf>, %29, %cst_23 [1] : vector<16x9xf32> to vector<16xf32>
    %31 = vector.shape_cast %30 : vector<16xf32> to vector<16x1xf32>
    %32 = vector.broadcast %31 : vector<16x1xf32> to vector<16x9xf32>
    %33 = arith.subf %29, %32 : vector<16x9xf32>
    %34 = math.exp %33 : vector<16x9xf32>
    %cst_24 = arith.constant dense<0.000000e+00> : vector<16xf32>
    %35 = vector.multi_reduction <add>, %34, %cst_24 [1] : vector<16x9xf32> to vector<16xf32>
    %36 = vector.shape_cast %35 : vector<16xf32> to vector<16x1xf32>
    %37 = tpu.reciprocal %36 {approx = true} : vector<16x1xf32> -> vector<16x1xf32>
    %38 = vector.broadcast %37 : vector<16x1xf32> to vector<16x9xf32>
    %39 = arith.mulf %34, %38 : vector<16x9xf32>
    %c0_25 = arith.constant 0 : index
    %c0_26 = arith.constant 0 : index
    %40 = vector.load %arg10[%c0_25, %c0_26] : memref<16x9xf32, #tpu.memory_space<vmem>>, vector<16x9xf32>
    tpu.vector_store %arg10[%c0_25, %c0_26], %39 {strides = array<i32>} : memref<16x9xf32, #tpu.memory_space<vmem>>, vector<16x9xf32>,
    return
  }
  func.func @transform_0(%arg0: i32) -> (i32, i32) {
    %c0_i32 = arith.constant 0 : i32
    %c0_i32_0 = arith.constant 0 : i32
    return %arg0, %c0_i32 : i32, i32
  }
  func.func @transform_1(%arg0: i32) -> (i32, i32) {
    %c0_i32 = arith.constant 0 : i32
    %c0_i32_0 = arith.constant 0 : i32
    %c0_i32_1 = arith.constant 0 : i32
    return %c0_i32, %c0_i32_0 : i32, i32
  }
  func.func @transform_2(%arg0: i32) -> (i32, i32) {
    %c0_i32 = arith.constant 0 : i32
    %c0_i32_0 = arith.constant 0 : i32
    %c0_i32_1 = arith.constant 0 : i32
    return %c0_i32, %c0_i32_0 : i32, i32
  }
  func.func @transform_3(%arg0: i32) -> (i32, i32) {
    %c0_i32 = arith.constant 0 : i32
    %c0_i32_0 = arith.constant 0 : i32
    %c0_i32_1 = arith.constant 0 : i32
    return %c0_i32, %c0_i32_0 : i32, i32
  }
  func.func @transform_4(%arg0: i32) -> (i32, i32) {
    %c0_i32 = arith.constant 0 : i32
    %c0_i32_0 = arith.constant 0 : i32
    %c0_i32_1 = arith.constant 0 : i32
    return %c0_i32, %c0_i32_0 : i32, i32
  }
  func.func @transform_5(%arg0: i32) -> (i32, i32) {
    %c0_i32 = arith.constant 0 : i32
    %c0_i32_0 = arith.constant 0 : i32
    %c0_i32_1 = arith.constant 0 : i32
    return %c0_i32, %c0_i32_0 : i32, i32
  }
  func.func @transform_6(%arg0: i32) -> (i32, i32) {
    %c0_i32 = arith.constant 0 : i32
    %c0_i32_0 = arith.constant 0 : i32
    %c0_i32_1 = arith.constant 0 : i32
    return %c0_i32, %c0_i32_0 : i32, i32
  }
  func.func @transform_7(%arg0: i32) -> (i32, i32) {
    %c0_i32 = arith.constant 0 : i32
    %c0_i32_0 = arith.constant 0 : i32
    %c0_i32_1 = arith.constant 0 : i32
    return %c0_i32, %c0_i32_0 : i32, i32
  }
  func.func @transform_8(%arg0: i32) -> (i32, i32) {
    %c0_i32 = arith.constant 0 : i32
    %c0_i32_0 = arith.constant 0 : i32
    %c0_i32_1 = arith.constant 0 : i32
    return %c0_i32, %c0_i32_0 : i32, i32
  }
  func.func @transform_9(%arg0: i32) -> (i32, i32) {
    %c0_i32 = arith.constant 0 : i32
    %c0_i32_0 = arith.constant 0 : i32
    return %arg0, %c0_i32 : i32, i32
  }
}

</mosaic_0001>

<bundles_post_ra>
// kernel: tpu_custom_call.1
= control target key start
LH: loop header
LB: loop body
LE: loop exit
PB: predicated region body
PF: predicated region fallthrough
CT: control target
= control target key end

     0   :  { %v542_v1 = vmov 0.0   ;;  %vm99_vm0 = vcmask 1045504   ;;  %vm543_vm1 = vmmov 0   ;;  %vm100_vm2 = vcmask 1046528   ;;  %s674_s0 = inlined_call_operand.vmem [shape: bf16[16,93], index: 0, kind: input, shape index: {}]   ;;  %s675_s1 = inlined_call_operand.vmem [shape: bf16[93,64], index: 1, kind: input, shape index: {}]   ;;  %s676_s2 = inlined_call_operand.vmem [shape: f32[1,64], index: 2, kind: input, shape index: {}]   ;;  %s677_s3 = inlined_call_operand.vmem [shape: bf16[64,32], index: 3, kind: input, shape index: {}]   ;;  %s678_s4 = inlined_call_operand.vmem [shape: f32[1,32], index: 4, kind: input, shape index: {}]   ;;  %s679_s5 = inlined_call_operand.vmem [shape: bf16[32,16], index: 5, kind: input, shape index: {}]   ;;  %s680_s6 = inlined_call_operand.vmem [shape: f32[1,16], index: 6, kind: input, shape index: {}]   ;;  %s681_s7 = inlined_call_operand.vmem [shape: bf16[16,9], index: 7, kind: input, shape index: {}]   ;;  %s682_s8 = inlined_call_operand.vmem [shape: f32[1,9], index: 8, kind: input, shape index: {}]   ;;  %s683_s9 = inlined_call_operand.hbm [shape: f32[16,9], index: 9, kind: output, shape index: {}]  }
   0x1   :  { %v496_v0 = vld [vmem:[%s675_s1] sm:$0xff]   ;;  %448 = vmatprep.subr.bf16.mxu0 %v542_v1  ;;  %464 = vmatprep.subr.bf16.mxu1 %v542_v1  ;;  %v497_v2 = vld [vmem:[%s675_s1 + $0x8] sm:$0xff]   ;;  %v498_v3 = vld [vmem:[%s675_s1 + $0x10] sm:$0xff]   ;;  %v544_v6 = vmov 65535  }
   0x2   :  { %449 = vmatpush3.bf16.msra.mxu0 %v496_v0  ;;  %460 = vmatprep.mubr.msk.bf16.mxu0 %vm543_vm1, %v542_v1  ;;  %v503_v4 = vld [vmem:[%s677_s3] sm:$0xff]   ;;  %v499_v5 = vld [vmem:[%s675_s1 + $0x18] sm:$0xff]   ;;  %v101_v7 = vsel %vm99_vm0, 4294967295, %v544_v6  ;;  %v504_v8 = vld [vmem:[%s677_s3 + $0x8] sm:$0xff]  }
   0x3   :  { %450 = vmatprep.subr.bf16.mxu0 %v542_v1  ;;  %472 = vmatprep.mubr.msk.bf16.mxu1 %vm543_vm1, %v542_v1 }
   0x4   :  { %465 = vmatpush3.bf16.msra.mxu1 %v503_v4 }
   0x5   :  { %466 = vmatprep.subr.bf16.mxu1 %v542_v1 }
   0x6   :  { %451 = vmatpush3.bf16.msra.mxu0 %v497_v2 }
   0x7   :  { %452 = vmatprep.subr.bf16.mxu0 %v542_v1 }
   0xa   :  { %453 = vmatpush3.bf16.msra.mxu0 %v498_v3 }
   0xb   :  { %454 = vmatprep.subr.bf16.mxu0 %v542_v1 }
   0xc   :  { %14 = vsyncpa [#allocation3], 0  ;;  %v500_v9 = vld [vmem:[%s675_s1 + $0x20] sm:$0xff]   ;;  %v501_v10 = vld [vmem:[%s675_s1 + $0x28] sm:$0x7f]   ;;  %467 = vmatpush3.bf16.msra.mxu1 %v504_v8  ;;  %v102_v11 = vsel %vm100_vm2, %v101_v7, 0 }
   0xd   :  { %468 = vmatprep.subr.bf16.mxu1 %v542_v1  ;;  %v104_v12 = vand.u32 %v501_v10, %v102_v11  ;;  %v502_v13 = vld [vmem:[%s674_s0] sm:$0xff]   ;;  %vm95_vm3 = vcmask 760832   ;;  %v505_v14 = vld [vmem:[%s677_s3 + $0x10] sm:$0xff]   ;;  %v506_v15 = vld [vmem:[%s677_s3 + $0x18] sm:$0xff]   ;;  %vm189_vm4 = vcmask 523264   ;;  %vm260_vm5 = vcmask 261120  }
   0xe   :  { %455 = vmatpush3.bf16.msra.mxu0 %v499_v5  ;;  %v409_v16 = vld [vmem:[%s676_s2] ss:$0 sm:$0xff]  ;;  %v508_v27 = vld [vmem:[%s679_s5 + $0x8] sm:$0xff]   ;;  %vm323_vm6 = vcmask 130048   ;;  %vm368_vm7 = vcmask 72704  }
   0xf   :  { %456 = vmatprep.subr.bf16.mxu0 %v542_v1  ;;  %v507_v26 = vld [vmem:[%s679_s5] sm:$0xff]  }
  0x10   :  { %469 = vmatpush3.bf16.msra.mxu1 %v505_v14  ;;  %v418_v28 = vld [vmem:[%s678_s4] ss:$0 sm:$0xff] }
  0x11   :  { %470 = vmatprep.subr.bf16.mxu1 %v542_v1  ;;  %v509_v38 = vld [vmem:[%s681_s7] sm:$0xff]  }
  0x12   :  { %457 = vmatpush3.bf16.msra.mxu0 %v500_v9  ;;  %v424_v39 = vld [vmem:[%s680_s6] ss:$0 sm:$0xff]  ;;  %s545_s6 = smov [#allocation2]  }
  0x13   :  { %458 = vmatprep.subr.bf16.mxu0 %v542_v1  ;;  %v428_v49 = vld [vmem:[%s682_s8] ss:$0 sm:$0xff]  ;;  %s398_s7 = sshll.u32 %s545_s6, 4  ;;  %s399_s7 = int_to_ptr.vmem [resolvable:$true] %s398_s7 }
  0x14   :  { %471 = vmatpush3.bf16.msra.mxu1 %v506_v15  ;;  %s518_s8 = scalar_lea.vmem %s399_s7, 256  ;;  %p523_p1 = scmp.lt.s32.totalorder %s399_s7, %s399_s7 }
  0x15   :  { %476 = vmatprep.subr.bf16.mxu1 %v542_v1  ;;  %p519_p0 = scmp.ne.s32.totalorder %s399_s7, %s518_s8  ;;  %p524_p2 = scmp.lt.s32.totalorder %s518_s8, %s518_s8 }
  0x16   :  { %459 = vmatpush3.bf16.msra.mxu0 %v104_v12 }
  0x17   :  { %484 = vmatprep.subr.bf16.mxu0 %v542_v1  ;;  %p525_p3 = por %p524_p2, %p523_p1 }
  0x19   :  { %461 = vmatmul.mubr.msk.bf16.vlgmr.msra.gmra.mrb[0].mxu0 %vm95_vm3, %v502_v13  ;;  %p526_p4 = pnand %p525_p3, %p519_p0 }
  0x1a   :  { %486 = vmatprep.mubr.msk.bf16.mxu0 %vm543_vm1, %v542_v1  ;;  %485 = vmatpush3.bf16.msra.mxu0 %v509_v38 }
  0xec   :  { %v140_v17 = vpop.f32.mrb[0].mxu0 }
  0xed   :  { %v141_v18 = vadd.f32 %v409_v16, %v140_v17  ;;  %v462_v19 = vpop.f32.mrb[1].mxu0 }
  0xee   :  { %v143_v20 = vpop.f32.mrb[2].mxu0 }
  0xef   :  { %v144_v21 = vadd.f32 %v409_v16, %v143_v20  ;;  %v463_v22 = vpop.f32.mrb[3].mxu0  ;;  %v147_v23 = vmax.f32 %v141_v18, 0.0 }
  0xf1   :  { %v148_v24 = vmax.f32 %v144_v21, 0.0 }
  0xf3   :  { %v149_v25 = vpack.c.bf16 %v148_v24, %v147_v23 }
  0xf5   :  { %473 = vmatmul.mubr.msk.bf16.vlgmr.msra.gmra.mrb[0].mxu1 %vm189_vm4, %v149_v25 }
  0xf6   :  { %480 = vmatprep.mubr.msk.bf16.mxu1 %vm543_vm1, %v542_v1  ;;  %477 = vmatpush3.bf16.msra.mxu1 %v507_v26 }
  0xf7   :  { %478 = vmatprep.subr.bf16.mxu1 %v542_v1 }
  0xfa   :  { %479 = vmatpush3.bf16.msra.mxu1 %v508_v27 }
 0x1c8   :  { %v227_v29 = vpop.f32.mrb[0].mxu1 }
 0x1c9   :  { %v228_v30 = vadd.f32 %v418_v28, %v227_v29  ;;  %v474_v31 = vpop.f32.mrb[1].mxu1 }
 0x1ca   :  { %v230_v32 = vpop.f32.mrb[2].mxu1 }
 0x1cb   :  { %v231_v33 = vadd.f32 %v418_v28, %v230_v32  ;;  %v475_v34 = vpop.f32.mrb[3].mxu1  ;;  %v234_v35 = vmax.f32 %v228_v30, 0.0 }
 0x1cd   :  { %v235_v36 = vmax.f32 %v231_v33, 0.0 }
 0x1cf   :  { %v236_v37 = vpack.c.bf16 %v235_v36, %v234_v35 }
 0x1d1   :  { %481 = vmatmul.mubr.msk.bf16.vlgmr.msra.gmra.mrb[4].mxu1 %vm260_vm5, %v236_v37 }
 0x2a4   :  { %v298_v40 = vpop.f32.mrb[4].mxu1 }
 0x2a5   :  { %v299_v41 = vadd.f32 %v424_v39, %v298_v40  ;;  %v482_v42 = vpop.f32.mrb[5].mxu1 }
 0x2a6   :  { %v301_v43 = vpop.f32.mrb[6].mxu1 }
 0x2a7   :  { %v302_v44 = vadd.f32 %v424_v39, %v301_v43  ;;  %v483_v45 = vpop.f32.mrb[7].mxu1  ;;  %v305_v46 = vmax.f32 %v299_v41, 0.0 }
 0x2a9   :  { %v306_v47 = vmax.f32 %v302_v44, 0.0 }
 0x2ab   :  { %v307_v48 = vpack.c.bf16 %v306_v47, %v305_v46 }
 0x2ad   :  { %487 = vmatmul.mubr.msk.bf16.vlgmr.msra.gmra.mrb[4].mxu0 %vm323_vm6, %v307_v48 }
 0x380   :  { %v361_v50 = vpop.f32.mrb[4].mxu0 }
 0x381   :  { %v362_v51 = vadd.f32 %v428_v49, %v361_v50  ;;  %v488_v52 = vpop.f32.mrb[5].mxu0 }
 0x382   :  { %v364_v53 = vpop.f32.mrb[6].mxu0 }
 0x383   :  { %v365_v54 = vadd.f32 %v428_v49, %v364_v53  ;;  %v489_v55 = vpop.f32.mrb[7].mxu0  ;;  %v369_v56 = vsel %vm368_vm7, %v362_v51, -inf }
 0x384   :  { %370 = vmax.xlane.f32.xlu0 %v369_v56 }
 0x385   :  { %v372_v57 = vsel %vm368_vm7, %v365_v54, -inf }
 0x388   :  { %373 = vmax.xlane.f32.xlu0 %v372_v57 }
 0x411   :  { %v371_v58 = vpop.xlane.xlu0 %370 }
 0x412   :  { %v375_v59 = vsub.f32 %v362_v51, %v371_v58 }
 0x414   :  { %v377_v60 = vmul.f32 1.442695, %v375_v59 }
 0x415   :  { %v374_v61 = vpop.xlane.xlu0 %373 }
 0x416   :  { %510 = vpow2.f32 %v377_v60  ;;  %v376_v62 = vsub.f32 %v365_v54, %v374_v61 }
 0x418   :  { %v379_v63 = vmul.f32 1.442695, %v376_v62 }
 0x41a   :  { %512 = vpow2.f32 %v379_v63 }
 0x420   :  { %v511_v0 = vpop.eup %510 }
 0x421   :  { %v381_v1 = vsel %vm368_vm7, %v511_v0, 0.0 }
 0x422   :  { %382 = vadd.xlane.f32.xlu1 %v381_v1 }
 0x424   :  { %v513_v2 = vpop.eup %512 }
 0x425   :  { %v384_v3 = vsel %vm368_vm7, %v513_v2, 0.0 }
 0x426   :  { %385 = vadd.xlane.f32.xlu1 %v384_v3 }
 0x4af   :  { %v383_v4 = vpop.xlane.xlu1 %382 }
 0x4b0   :  { %514 = vrcp.f32 %v383_v4 }
 0x4b3   :  { %v386_v5 = vpop.xlane.xlu1 %385 }
 0x4b4   :  { %516 = vrcp.f32 %v386_v5 }
 0x4ba   :  { %v515_v6 = vpop.eup %514 }
 0x4bb   :  { %v389_v7 = vmul.f32 %v515_v6, %v511_v0 }
 0x4bd   :  { %391 = vst.msk [vmem:[#allocation2] sm:$0xff] %vm368_vm7, %v389_v7 }
 0x4be   :  { %v517_v8 = vpop.eup %516 }
 0x4bf   :  { %v390_v9 = vmul.f32 %v517_v8, %v513_v2 }
 0x4c1   :  { %392 = vst.msk [vmem:[#allocation2 + $0x8] sm:$0xff] %vm368_vm7, %v390_v9 }
 0x4c2   :  { %529 = shalt.err (!%p526_p4)
}
 0x4c3   :  { %s530_s20 = scalar_lea.hbm %s683_s9, 256 }
 0x4c4   :  { %p531_p5 = scmp.ne.s32.totalorder %s683_s9, %s530_s20  ;;  %p534_p6 = scmp.lt.u32.totalorder %s530_s20, %s683_s9 }
 0x4c6   :  { %p536_p7 = pnand %p534_p6, %p531_p5 }
 0x4c8   :  { %539 = shalt.err (!%p536_p7)
}
 0x4c9   :  { %s546_s25 = smov 128   ;;  %s547_s26 = smov 8  }
 0x4ca   :  { %404 = dma.vmem_to_hbm [thread:$0]  %s399_s7, 256, %s683_s9, [#allocation3], %s546_s25, %s546_s25, %s547_s26  }
 0x4cb   :  { %540 = dma.done.wait [#allocation3], 256  }
 0x4cc   :  { %541 = vsyncadd [#allocation3], 4294967040 }
 0x4cd   :  { %408 = vsyncpa [#allocation3], 1 }

</bundles_post_ra>
